<compile_context>
chip_gen: v7x
topology: tpu7x:2x2x1
jax: 0.10.0
libtpu: 0.0.40
codegen_flags: <defaults>
</compile_context>

<pallas_src>
import functools

import jax
import jax.numpy as jnp
from jax.experimental import pallas as pl
from jax.experimental.pallas import tpu as pltpu


# ---------------------------------------------------------------------------
# Pallas kernels
# ---------------------------------------------------------------------------

def _mm_affine_kernel(a_ref, b_ref, s_ref, bias_ref, o_ref, *, relu):
    """o = (A @ B) * scale + bias, optional ReLU.  A/B bf16, accum/epilogue f32."""
    acc = jnp.dot(a_ref[...], b_ref[...], preferred_element_type=jnp.float32)
    y = acc * s_ref[...] + bias_ref[...]
    if relu:
        y = jnp.maximum(y, 0.0)
    o_ref[...] = y.astype(o_ref.dtype)


def pallas_matmul_affine(a, b, scale, bias, relu=False):
    """a: (M, K), b: (K, N) bf16, scale/bias: (1, N) f32.  Returns (M, N) f32.

    Tiling: tm=256 (full M if smaller), tn=256/128/full-N, full K per tile.
    No host-side padding of `a`; weights/scale/bias are prepared once at init.
    """
    M, K = a.shape
    K2, N = b.shape
    assert K == K2 and scale.shape == (1, N) and bias.shape == (1, N)

    if N % 256 == 0:
        tn = 256
    elif N % 128 == 0:
        tn = 128
    else:
        tn = N                       # full-extent lane block (legal: equals dim)
    tm = 256 if M >= 256 else M      # full-extent sublane block when M is small

    grid = (N // tn, pl.cdiv(M, tm))  # weights outer, rows inner (weights resident)

    return pl.pallas_call(
        functools.partial(_mm_affine_kernel, relu=relu),
        out_shape=jax.ShapeDtypeStruct((M, N), jnp.float32),
        grid=grid,
        in_specs=[
            pl.BlockSpec((tm, K), lambda j, i: (i, 0)),
            pl.BlockSpec((K, tn), lambda j, i: (0, j)),
            pl.BlockSpec((1, tn), lambda j, i: (0, j)),
            pl.BlockSpec((1, tn), lambda j, i: (0, j)),
        ],
        out_specs=pl.BlockSpec((tm, tn), lambda j, i: (i, j)),
        compiler_params=pltpu.CompilerParams(
            dimension_semantics=("parallel", "parallel")),
    )(a.astype(jnp.bfloat16), b, scale, bias)


def _add_relu_kernel(a_ref, b_ref, o_ref):
    o_ref[...] = jnp.maximum(a_ref[...] + b_ref[...], 0.0)


def pallas_add_relu(a, b):
    """Residual add + ReLU on same-shape f32 tensors, lane-dense (rows,128) tiles."""
    shape, size = a.shape, a.size
    lanes = 128
    rows = pl.cdiv(size, lanes)
    pad = rows * lanes - size
    a_f, b_f = a.reshape(-1), b.reshape(-1)
    if pad:
        a_f = jnp.pad(a_f, (0, pad))
        b_f = jnp.pad(b_f, (0, pad))
    a2, b2 = a_f.reshape(rows, lanes), b_f.reshape(rows, lanes)
    tr = 1024 if rows >= 1024 else rows          # bounded VMEM per block
    out = pl.pallas_call(
        _add_relu_kernel,
        out_shape=jax.ShapeDtypeStruct((rows, lanes), jnp.float32),
        grid=(pl.cdiv(rows, tr),),
        in_specs=[pl.BlockSpec((tr, lanes), lambda i: (i, 0)),
                  pl.BlockSpec((tr, lanes), lambda i: (i, 0))],
        out_specs=pl.BlockSpec((tr, lanes), lambda i: (i, 0)),
        compiler_params=pltpu.CompilerParams(dimension_semantics=("parallel",)),
    )(a2, b2)
    out = out.reshape(-1)
    if pad:
        out = out[:size]
    return out.reshape(shape)


def _heads_kernel(x_ref, w_ref, b_ref, o_ref, *, num_heads, head_pad):
    """Fused digit heads: one matmul, then a masked softmax per 32-lane segment.
    Padding lanes inside each segment carry bias -1e30 (-> exp == 0)."""
    logits = jnp.dot(x_ref[...], w_ref[...],
                     preferred_element_type=jnp.float32) + b_ref[...]
    lane = jax.lax.broadcasted_iota(jnp.int32, logits.shape, 1)
    seg = lane // head_pad
    out = jnp.zeros_like(logits)
    for h in range(num_heads):
        mask = seg == h
        lh = jnp.where(mask, logits, -jnp.inf)
        m = jnp.max(lh, axis=-1, keepdims=True)
        e = jnp.exp(lh - m)                      # zero outside segment
        out = out + e / jnp.sum(e, axis=-1, keepdims=True)
    o_ref[...] = out.astype(o_ref.dtype)


def pallas_heads_softmax(x, w_heads, b_heads, num_heads=4, head_pad=32, n_cls=19):
    """x: (B, 512); w_heads: (512, num_heads*head_pad) bf16; b_heads: (1, NP) f32."""
    B, F = x.shape
    NP = num_heads * head_pad
    probs = pl.pallas_call(
        functools.partial(_heads_kernel, num_heads=num_heads, head_pad=head_pad),
        out_shape=jax.ShapeDtypeStruct((B, NP), jnp.float32),
        grid=(1,),
        in_specs=[pl.BlockSpec((B, F), lambda i: (0, 0)),
                  pl.BlockSpec((F, NP), lambda i: (0, 0)),
                  pl.BlockSpec((1, NP), lambda i: (0, 0))],
        out_specs=pl.BlockSpec((B, NP), lambda i: (0, 0)),
    )(x.astype(jnp.bfloat16), w_heads, b_heads)
    return tuple(probs[:, h * head_pad:h * head_pad + n_cls]
                 for h in range(num_heads))


# ---------------------------------------------------------------------------
# Layers built on the kernels
# ---------------------------------------------------------------------------

def bn_scale_bias(gamma, beta, mean, var, eps=1e-5):
    s = gamma / jnp.sqrt(var + eps)
    return s, beta - mean * s


def conv2d_bn_act(x, cp, stride, padding, relu):
    """x: NHWC f32; cp: prepared conv {'w': (KH*KW*IC, OC) bf16, 'scale','bias': (1,OC)}."""
    N, H, W, C = x.shape
    k_total, OC = cp['w'].shape
    ksz = int(round((k_total // C) ** 0.5))      # square kernels in resnet18
    KH = KW = ksz
    OH = (H + 2 * padding - KH) // stride + 1
    OW = (W + 2 * padding - KW) // stride + 1
    xb = x.astype(jnp.bfloat16)                  # halve im2col HBM traffic; MXU is bf16
    if padding:
        xb = jnp.pad(xb, ((0, 0), (padding, padding), (padding, padding), (0, 0)))
    # TODO(synk): im2col is still materialized host-side (~KH*KW x activation bytes);
    # fusing the (kh,kw) loop into the matmul kernel via shifted index_maps / manual
    # DMA would remove this blow-up entirely.
    patches = [xb[:, kh:kh + stride * (OH - 1) + 1:stride,
                    kw:kw + stride * (OW - 1) + 1:stride, :]
               for kh in range(KH) for kw in range(KW)]
    pat = jnp.stack(patches, axis=3).reshape(N * OH * OW, KH * KW * C)
    out = pallas_matmul_affine(pat, cp['w'], cp['scale'], cp['bias'], relu=relu)
    return out.reshape(N, OH, OW, OC)


def linear(x, lp, relu=False):
    return pallas_matmul_affine(x, lp['w'], lp['scale'], lp['bias'], relu=relu)


def maxpool_3x3_s2_p1(x):
    """nn.MaxPool2d(kernel_size=3, stride=2, padding=1) on NHWC (plain-JAX glue)."""
    N, H, W, C = x.shape
    OH = (H + 2 - 3) // 2 + 1
    OW = (W + 2 - 3) // 2 + 1
    xp = jnp.pad(x, ((0, 0), (1, 1), (1, 1), (0, 0)), constant_values=-jnp.inf)
    out = jnp.full((N, OH, OW, C), -jnp.inf, x.dtype)
    for kh in range(3):
        for kw in range(3):
            out = jnp.maximum(
                out, xp[:, kh:kh + 2 * OH - 1:2, kw:kw + 2 * OW - 1:2, :])
    return out


# ---------------------------------------------------------------------------
# Deterministic parameter init (resnet18 shapes + replaced fc + digit heads)
# ---------------------------------------------------------------------------

def init_params(key):
    keys = iter(jax.random.split(key, 256))
    nk = lambda: next(keys)

    def conv_w(oc, ic, kh, kw):
        fan_in = ic * kh * kw
        return jax.random.normal(nk(), (oc, ic, kh, kw),
                                 jnp.float32) * (2.0 / fan_in) ** 0.5

    def bn_p(c):
        return dict(
            gamma=1.0 + 0.1 * jax.random.normal(nk(), (c,), jnp.float32),
            beta=0.1 * jax.random.normal(nk(), (c,), jnp.float32),
            mean=0.1 * jax.random.normal(nk(), (c,), jnp.float32),
            var=jnp.ones((c,), jnp.float32),
        )

    def lin_p(out_f, in_f):
        return dict(
            w=jax.random.normal(nk(), (out_f, in_f),
                                jnp.float32) * (1.0 / in_f) ** 0.5,
            b=0.01 * jax.random.normal(nk(), (out_f,), jnp.float32),
        )

    params = dict(conv1=conv_w(64, 3, 7, 7), bn1=bn_p(64))
    layers = []
    in_c = 64
    for out_c, stride in ((64, 1), (128, 2), (256, 2), (512, 2)):
        blocks = []
        for bi in range(2):
            s = stride if bi == 0 else 1
            ic = in_c if bi == 0 else out_c
            blk = dict(
                conv1=conv_w(out_c, ic, 3, 3), bn1=bn_p(out_c),
                conv2=conv_w(out_c, out_c, 3, 3), bn2=bn_p(out_c),
                down=None, down_bn=None,
            )
            if s != 1 or ic != out_c:
                blk['down'] = conv_w(out_c, ic, 1, 1)
                blk['down_bn'] = bn_p(out_c)
            blocks.append(blk)
        layers.append(blocks)
        in_c = out_c
    params['layers'] = layers
    params['fc1'] = lin_p(512, 512)   # pretrained.fc[0]
    params['fc2'] = lin_p(512, 512)   # pretrained.fc[2]
    for name in ('digit1', 'digit2', 'digit3', 'digit4'):
        params[name] = lin_p(19, 512)
    return params


# ---------------------------------------------------------------------------
# One-time parameter preparation (BN folding, reshapes, bf16 casts, head packing)
# ---------------------------------------------------------------------------

def _prep_conv(w, bn):
    s, b = bn_scale_bias(**bn)
    OC, IC, KH, KW = w.shape
    w_mat = jnp.transpose(w, (2, 3, 1, 0)).reshape(KH * KW * IC, OC)
    return dict(w=w_mat.astype(jnp.bfloat16),
                scale=s.reshape(1, OC).astype(jnp.float32),
                bias=b.reshape(1, OC).astype(jnp.float32))


def _prep_linear(lp):
    out_f, in_f = lp['w'].shape
    return dict(w=jnp.transpose(lp['w']).astype(jnp.bfloat16),
                scale=jnp.ones((1, out_f), jnp.float32),
                bias=lp['b'].reshape(1, out_f).astype(jnp.float32))


def _prep_heads(params, head_pad=32):
    ws, bs = [], []
    for name in ('digit1', 'digit2', 'digit3', 'digit4'):
        w, b = params[name]['w'], params[name]['b']          # (19, 512), (19,)
        n, f = w.shape
        ws.append(jnp.zeros((f, head_pad), jnp.float32).at[:, :n].set(w.T))
        bs.append(jnp.full((head_pad,), -1e30, jnp.float32).at[:n].set(b))
    return (jnp.concatenate(ws, axis=1).astype(jnp.bfloat16),        # (512, 128)
            jnp.concatenate(bs).reshape(1, -1).astype(jnp.float32))  # (1, 128)


def prepare_params(params):
    prep = dict(conv1=_prep_conv(params['conv1'], params['bn1']))
    layers = []
    for layer in params['layers']:
        blocks = []
        for blk in layer:
            blocks.append(dict(
                conv1=_prep_conv(blk['conv1'], blk['bn1']),
                conv2=_prep_conv(blk['conv2'], blk['bn2']),
                down=(None if blk['down'] is None
                      else _prep_conv(blk['down'], blk['down_bn'])),
            ))
        layers.append(blocks)
    prep['layers'] = layers
    prep['fc1'] = _prep_linear(params['fc1'])
    prep['fc2'] = _prep_linear(params['fc2'])
    prep['heads_w'], prep['heads_b'] = _prep_heads(params)
    return prep


# ---------------------------------------------------------------------------
# Forward pass (matches MyAlexNet.forward semantics)
# ---------------------------------------------------------------------------

def resnet18_backbone(prep, x_nhwc):
    y = conv2d_bn_act(x_nhwc, prep['conv1'], stride=2, padding=3, relu=True)
    y = maxpool_3x3_s2_p1(y)
    for li, layer in enumerate(prep['layers']):
        for bi, blk in enumerate(layer):
            stride = 2 if (li > 0 and bi == 0) else 1
            identity = y
            out = conv2d_bn_act(y, blk['conv1'], stride=stride, padding=1, relu=True)
            out = conv2d_bn_act(out, blk['conv2'], stride=1, padding=1, relu=False)
            if blk['down'] is not None:
                identity = conv2d_bn_act(y, blk['down'], stride=stride, padding=0,
                                         relu=False)
            y = pallas_add_relu(out, identity)
    feat = jnp.mean(y, axis=(1, 2))                 # AdaptiveAvgPool2d((1,1))
    feat = linear(feat, prep['fc1'], relu=True)     # fc[0] + fc[1] ReLU
    feat = linear(feat, prep['fc2'], relu=False)    # fc[2]
    return feat                                     # (B, 512)


def my_alexnet_forward(prep, x_nchw):
    x = jnp.transpose(x_nchw, (0, 2, 3, 1)).astype(jnp.float32)   # NCHW -> NHWC
    feat = resnet18_backbone(prep, x)
    return pallas_heads_softmax(feat, prep['heads_w'], prep['heads_b'])


# ---------------------------------------------------------------------------

if __name__ == "__main__":
    key = jax.random.PRNGKey(0)
    kp, kx, ka, kb = jax.random.split(key, 4)
    params = init_params(kp)
    prep = prepare_params(params)

    # Self-check of the fused matmul kernel on an MXU-unaligned contraction (K=147,
    # like conv1) against a plain-JAX reference using the SAME bf16 operands.
    at = jax.random.normal(ka, (512, 147), jnp.float32).astype(jnp.bfloat16)
    bt = jax.random.normal(kb, (147, 64), jnp.float32).astype(jnp.bfloat16)
    sc = jnp.linspace(0.5, 1.5, 64).reshape(1, 64).astype(jnp.float32)
    bi = jnp.linspace(-0.3, 0.3, 64).reshape(1, 64).astype(jnp.float32)
    ref = jnp.maximum(
        jnp.dot(at.astype(jnp.float32), bt.astype(jnp.float32)) * sc + bi, 0.0)
    got = pallas_matmul_affine(at, bt, sc, bi, relu=True)
    assert bool(jnp.allclose(ref, got, atol=1e-2, rtol=1e-2))

    # Small-but-valid input: resnet18 downsamples by 32x, so 32x32 spatial works.
    x = jax.random.normal(kx, (2, 3, 32, 32), jnp.float32)
    fwd = jax.jit(my_alexnet_forward)
    d1, d2, d3, d4 = fwd(prep, x)
    jax.block_until_ready((d1, d2, d3, d4))

    assert d1.shape == (2, 19) and d2.shape == (2, 19)
    assert d3.shape == (2, 19) and d4.shape == (2, 19)
    for d in (d1, d2, d3, d4):
        assert bool(jnp.allclose(jnp.sum(d, axis=1), 1.0, atol=1e-4))
    print("KERNEL_OK")
</pallas_src>

<mosaic_0001>
module attributes {stable_mosaic.version = 11 : i64} {
  func.func @_mm_affine_kernel(%arg0: i32, %arg1: i32, %arg2: memref<256x147xbf16, #tpu.memory_space<vmem>>, %arg3: memref<147x64xbf16, #tpu.memory_space<vmem>>, %arg4: memref<1x64xf32, #tpu.memory_space<vmem>>, %arg5: memref<1x64xf32, #tpu.memory_space<vmem>>, %arg6: memref<256x64xf32, #tpu.memory_space<vmem>>) attributes {dimension_semantics = [#tpu.dimension_semantics<parallel>, #tpu.dimension_semantics<parallel>], iteration_bounds = array<i64: 1, 2>, scalar_prefetch = 0 : i64, scratch_operands = 0 : i64, tpu.core_type = #tpu.core_type<tc>, window_params = [{transform_indices = @transform_0, window_bounds = array<i64: 256, 147>}, {transform_indices = @transform_1, window_bounds = array<i64: 147, 64>}, {transform_indices = @transform_2, window_bounds = array<i64: 1, 64>}, {transform_indices = @transform_3, window_bounds = array<i64: 1, 64>}, {transform_indices = @transform_4, window_bounds = array<i64: 256, 64>}]} {
    %c0 = arith.constant 0 : index
    %c0_0 = arith.constant 0 : index
    %0 = vector.load %arg2[%c0, %c0_0] : memref<256x147xbf16, #tpu.memory_space<vmem>>, vector<256x147xbf16>
    %c0_1 = arith.constant 0 : index
    %c0_2 = arith.constant 0 : index
    %1 = vector.load %arg3[%c0_1, %c0_2] : memref<147x64xbf16, #tpu.memory_space<vmem>>, vector<147x64xbf16>
    %cst = arith.constant dense<0.000000e+00> : vector<256x64xf32>
    %2 = tpu.matmul %0, %1, %cst {dimension_numbers = #tpu.dot_dimension_numbers<[1], [0], [0], [1], [0, 0, 1, 1], [], []>} : vector<256x147xbf16>, vector<147x64xbf16>, vector<256x64xf32> -> vector<256x64xf32>
    %c0_3 = arith.constant 0 : index
    %c0_4 = arith.constant 0 : index
    %3 = vector.load %arg4[%c0_3, %c0_4] : memref<1x64xf32, #tpu.memory_space<vmem>>, vector<1x64xf32>
    %4 = vector.broadcast %3 : vector<1x64xf32> to vector<256x64xf32>
    %5 = arith.mulf %2, %4 : vector<256x64xf32>
    %c0_5 = arith.constant 0 : index
    %c0_6 = arith.constant 0 : index
    %6 = vector.load %arg5[%c0_5, %c0_6] : memref<1x64xf32, #tpu.memory_space<vmem>>, vector<1x64xf32>
    %7 = vector.broadcast %6 : vector<1x64xf32> to vector<256x64xf32>
    %8 = arith.addf %5, %7 : vector<256x64xf32>
    %cst_7 = arith.constant 0.000000e+00 : f32
    %9 = vector.broadcast %cst_7 : f32 to vector<256x64xf32>
    %10 = arith.maximumf %8, %9 : vector<256x64xf32>
    %c0_8 = arith.constant 0 : index
    %c0_9 = arith.constant 0 : index
    %11 = vector.load %arg6[%c0_8, %c0_9] : memref<256x64xf32, #tpu.memory_space<vmem>>, vector<256x64xf32>
    tpu.vector_store %arg6[%c0_8, %c0_9], %10 {strides = array<i32>} : memref<256x64xf32, #tpu.memory_space<vmem>>, vector<256x64xf32>,
    return
  }
  func.func @transform_0(%arg0: i32, %arg1: i32) -> (i32, i32) {
    %c0_i32 = arith.constant 0 : i32
    %c0_i32_0 = arith.constant 0 : i32
    return %arg1, %c0_i32 : i32, i32
  }
  func.func @transform_1(%arg0: i32, %arg1: i32) -> (i32, i32) {
    %c0_i32 = arith.constant 0 : i32
    %c0_i32_0 = arith.constant 0 : i32
    return %c0_i32, %arg0 : i32, i32
  }
  func.func @transform_2(%arg0: i32, %arg1: i32) -> (i32, i32) {
    %c0_i32 = arith.constant 0 : i32
    %c0_i32_0 = arith.constant 0 : i32
    return %c0_i32, %arg0 : i32, i32
  }
  func.func @transform_3(%arg0: i32, %arg1: i32) -> (i32, i32) {
    %c0_i32 = arith.constant 0 : i32
    %c0_i32_0 = arith.constant 0 : i32
    return %c0_i32, %arg0 : i32, i32
  }
  func.func @transform_4(%arg0: i32, %arg1: i32) -> (i32, i32) {
    %c0_i32 = arith.constant 0 : i32
    return %arg1, %arg0 : i32, i32
  }
}

</mosaic_0001>

<bundles_post_ra>
// kernel: tpu_custom_call.1
= control target key start
LH: loop header
LB: loop body
LE: loop exit
PB: predicated region body
PF: predicated region fallthrough
CT: control target
= control target key end

     0   :  { %s1227_s15 = smov 0   ;;  %s1229_s16 = smov 0   ;;  %s1487_s0 = inlined_call_operand.vmem [shape: bf16[512,147], index: 0, kind: input, shape index: {}]   ;;  %s1488_s1 = inlined_call_operand.vmem [shape: bf16[147,64], index: 1, kind: input, shape index: {}]   ;;  %s1489_s2 = inlined_call_operand.vmem [shape: f32[1,64], index: 2, kind: input, shape index: {}]   ;;  %s1490_s3 = inlined_call_operand.vmem [shape: f32[1,64], index: 3, kind: input, shape index: {}]   ;;  %s1491_s4 = inlined_call_operand.vmem [shape: f32[512,64], index: 4, kind: output, shape index: {}]  }
   0x1   :  { %s1231_s17 = smov 0  }
   0x2 LB: > { %s23_s18 = sadd.s32 1, %s1194_s16  ;;  %p1003_p0 = scmp.ge.s32.totalorder %s1198_s17, 1  ;;  %s1198_s17 = sphi %s1231_s17, %s14_s17   ;;  %s1194_s16 = sphi %s1229_s16, %s1493_s16   ;;  %s1190_s15 = sphi %s1227_s15, %s1492_s15  }
   0x3   : > { %p24_p1 = scmp.ge.s32.totalorder %s23_s18, 2  ;;  %p203_p2 = scmp.lt.s32.totalorder %s1198_s17, 3 }
   0x5   : > { %s1495_s18 = smov (%p24_p1, %s23_s18), 0  ;;  %p204_p3 = pnand %p1003_p0, %p203_p2 }
   0x6   : > { %v1118_v0 = vld [vmem:[%s1488_s1] sm:$0xff] (!%p204_p3)   ;;  %v1200_v1 = vmov (!%p204_p3), 0   ;;  %v1119_v2 = vld [vmem:[%s1488_s1 + $0x8] sm:$0xff] (!%p204_p3)   ;;  %v1120_v3 = vld [vmem:[%s1488_s1 + $0x10] sm:$0xff] (!%p204_p3)   ;;  %s1004_s25 = sshll.u32 (!%p204_p3), %s1190_s15, 5  ;;  %vm522_vm0 = vcmask (!%p204_p3), 154624  }
   0x7   : > { %207 = sbr.rel (%p204_p3) target bundleno = 324 (0x144), region = 36  ;;  %578 = vmatprep.subr.bf16.mxu0 (!%p204_p3), %v1200_v1  ;;  %1072 = vmatprep.subr.bf16.mxu1 (!%p204_p3), %v1200_v1  ;;  %p244_p4 = scmp.lt.s32.totalorder (!%p204_p3), %s1004_s25, 63  ;;  %v1121_v4 = vld [vmem:[%s1488_s1 + $0x18] sm:$0xff] (!%p204_p3)   ;;  %v1122_v5 = vld [vmem:[%s1488_s1 + $0x20] sm:$0xff] (!%p204_p3)   ;;  %v1123_v8 = vld [vmem:[%s1488_s1 + $0x28] sm:$0xff] (!%p204_p3)   ;;  %vm571_vm1 = vcmask (!%p204_p3), 1040384  }
   0x8   : > { %579 = vmatpush1.bf16.msra.mxu0 (!%p204_p3), %v1118_v0  ;;  %1082 = vmatpush1.bf16.msra.mxu1 (!%p204_p3), %v1118_v0  ;;  %v1124_v9 = vld [vmem:[%s1488_s1 + $0x30] sm:$0xff] (!%p204_p3)   ;;  %v1125_v10 = vld [vmem:[%s1488_s1 + $0x38] sm:$0xff] (!%p204_p3)   ;;  %vm572_vm2 = vcmask (!%p204_p3), 1041408   ;;  %v1201_v11 = vmov (!%p204_p3), 65535   ;;  %v1126_v13 = vld [vmem:[%s1488_s1 + $0x40] sm:$0xff] (!%p204_p3)   ;;  %vm849_vm3 = vcmask (!%p204_p3), 523264  }
   0x9   : > { %580 = vmatprep.subr.bf16.mxu0 (!%p204_p3), %v1200_v1  ;;  %1073 = vmatprep.subr.bf16.mxu1 (!%p204_p3), %v1200_v1  ;;  %v573_v12 = vsel (!%p204_p3), %vm571_vm1, 4294967295, %v1201_v11  ;;  %v1127_v14 = vld [vmem:[%s1488_s1 + $0x48] ss:$0 sps:$4 sm:$0x33] (!%p204_p3)   ;;  %v1336_v47 = vld [vmem:[%s1489_s2] ss:$0 sm:$0xff] (!%p204_p3) }
   0xa   : > { %v574_v15 = vsel (!%p204_p3), %vm572_vm2, %v573_v12, 0  ;;  %v1341_v49 = vld [vmem:[%s1490_s3] ss:$0 sm:$0xff] (!%p204_p3) }
   0xb   : > { %v576_v16 = vand.u32 (!%p204_p3), %v1127_v14, %v574_v15 }
   0xc   : > { %581 = vmatpush1.bf16.msra.mxu0 (!%p204_p3), %v1119_v2  ;;  %1083 = vmatpush1.bf16.msra.mxu1 (!%p204_p3), %v1119_v2 }
   0xd   : > { %582 = vmatprep.subr.bf16.mxu0 (!%p204_p3), %v1200_v1  ;;  %1074 = vmatprep.subr.bf16.mxu1 (!%p204_p3), %v1200_v1 }
   0xe   : > { %s1497_s25 = smov (!%p244_p4, %s1004_s25), 63 }
   0xf   : > { %s1071_s28 = sshll.u32 %s1497_s25, 3 }
  0x10   : > { %583 = vmatpush1.bf16.msra.mxu0 %v1120_v3  ;;  %1084 = vmatpush1.bf16.msra.mxu1 %v1120_v3  ;;  %s1265_s5 = scalar_lea.vmem %s1487_s0, %s1071_s28  ;;  %s1354_s29 = scalar_lea.vmem %s1491_s4, %s1071_s28 }
  0x11   : > { %584 = vmatprep.subr.bf16.mxu0 %v1200_v1  ;;  %1075 = vmatprep.subr.bf16.mxu1 %v1200_v1  ;;  %v1130_v6 = vld [vmem:[%s1265_s5 + $0x4] ss:$8 sps:$4 sm:$0xff]   ;;  %v1128_v17 = vld [vmem:[%s1265_s5] ss:$8 sps:$4 sm:$0xff]   ;;  %v1134_v19 = vld [vmem:[%s1265_s5 + $0x14] ss:$8 sps:$4 sm:$0xff]  }
  0x12   : > { %v1133_v7 = vld [vmem:[%s1265_s5 + $0x84] ss:$8 sps:$4 sm:$0xff]   ;;  %1051 = vmatprep.mubr.msk.bf16.mxu0 %vm522_vm0, %v1130_v6  ;;  %v1131_v18 = vld [vmem:[%s1265_s5 + $0x80] ss:$8 sps:$4 sm:$0xff]   ;;  %v1136_v20 = vld [vmem:[%s1265_s5 + $0x94] ss:$8 sps:$4 sm:$0xff]  }
  0x13   : > { %1059 = vmatprep.mubr.msk.bf16.mxu1 %vm522_vm0, %v1133_v7  ;;  %v1138_v21 = vld [vmem:[%s1265_s5 + $0x10] ss:$8 sps:$4 sm:$0xff]   ;;  %v1140_v23 = vld [vmem:[%s1265_s5 + $0x24] ss:$8 sps:$4 sm:$0xff]   ;;  %v1144_v25 = vld [vmem:[%s1265_s5 + $0x20] ss:$8 sps:$4 sm:$0xff]  }
  0x14   : > { %585 = vmatpush1.bf16.msra.mxu0 %v1121_v4  ;;  %1085 = vmatpush1.bf16.msra.mxu1 %v1121_v4  ;;  %v1139_v22 = vld [vmem:[%s1265_s5 + $0x90] ss:$8 sps:$4 sm:$0xff]   ;;  %v1142_v24 = vld [vmem:[%s1265_s5 + $0xa4] ss:$8 sps:$4 sm:$0xff]   ;;  %v1145_v26 = vld [vmem:[%s1265_s5 + $0xa0] ss:$8 sps:$4 sm:$0xff]  }
  0x15   : > { %586 = vmatprep.subr.bf16.mxu0 %v1200_v1  ;;  %1076 = vmatprep.subr.bf16.mxu1 %v1200_v1  ;;  %v1146_v27 = vld [vmem:[%s1265_s5 + $0x34] ss:$8 sps:$4 sm:$0xff]   ;;  %v1150_v29 = vld [vmem:[%s1265_s5 + $0x30] ss:$8 sps:$4 sm:$0xff]   ;;  %v1152_v31 = vld [vmem:[%s1265_s5 + $0x44] ss:$8 sps:$4 sm:$0xff]  }
  0x16   : > { %v1148_v28 = vld [vmem:[%s1265_s5 + $0xb4] ss:$8 sps:$4 sm:$0xff]   ;;  %v1151_v30 = vld [vmem:[%s1265_s5 + $0xb0] ss:$8 sps:$4 sm:$0xff]   ;;  %v1154_v32 = vld [vmem:[%s1265_s5 + $0xc4] ss:$8 sps:$4 sm:$0xff]  }
  0x17   : > { %v1156_v33 = vld [vmem:[%s1265_s5 + $0x40] ss:$8 sps:$4 sm:$0xff]   ;;  %v1158_v35 = vld [vmem:[%s1265_s5 + $0x54] ss:$8 sps:$4 sm:$0xff]   ;;  %v1162_v37 = vld [vmem:[%s1265_s5 + $0x50] ss:$8 sps:$4 sm:$0xff]  }
  0x18   : > { %587 = vmatpush1.bf16.msra.mxu0 %v1122_v5  ;;  %1086 = vmatpush1.bf16.msra.mxu1 %v1122_v5  ;;  %v1157_v34 = vld [vmem:[%s1265_s5 + $0xc0] ss:$8 sps:$4 sm:$0xff]   ;;  %v1160_v36 = vld [vmem:[%s1265_s5 + $0xd4] ss:$8 sps:$4 sm:$0xff]   ;;  %v1163_v38 = vld [vmem:[%s1265_s5 + $0xd0] ss:$8 sps:$4 sm:$0xff]  }
  0x19   : > { %588 = vmatprep.subr.bf16.mxu0 %v1200_v1  ;;  %1077 = vmatprep.subr.bf16.mxu1 %v1200_v1  ;;  %v1164_v39 = vld [vmem:[%s1265_s5 + $0x64] ss:$8 sps:$4 sm:$0xff]   ;;  %v1168_v41 = vld [vmem:[%s1265_s5 + $0x60] ss:$8 sps:$4 sm:$0xff]   ;;  %v1170_v43 = vld [vmem:[%s1265_s5 + $0x74] ss:$8 sps:$4 sm:$0xff]  }
  0x1a   : > { %v1166_v40 = vld [vmem:[%s1265_s5 + $0xe4] ss:$8 sps:$4 sm:$0xff]   ;;  %v1169_v42 = vld [vmem:[%s1265_s5 + $0xe0] ss:$8 sps:$4 sm:$0xff]   ;;  %v1172_v44 = vld [vmem:[%s1265_s5 + $0xf4] ss:$8 sps:$4 sm:$0xff]  }
  0x1b   : > { %v1174_v45 = vld [vmem:[%s1265_s5 + $0x70] ss:$8 sps:$4 sm:$0xff]  }
  0x1c   : > { %589 = vmatpush1.bf16.msra.mxu0 %v1123_v8  ;;  %1087 = vmatpush1.bf16.msra.mxu1 %v1123_v8  ;;  %v1175_v46 = vld [vmem:[%s1265_s5 + $0xf0] ss:$8 sps:$4 sm:$0xff]  }
  0x1d   : > { %590 = vmatprep.subr.bf16.mxu0 %v1200_v1  ;;  %1078 = vmatprep.subr.bf16.mxu1 %v1200_v1 }
  0x20   : > { %591 = vmatpush1.bf16.msra.mxu0 %v1124_v9  ;;  %1088 = vmatpush1.bf16.msra.mxu1 %v1124_v9 }
  0x21   : > { %592 = vmatprep.subr.bf16.mxu0 %v1200_v1  ;;  %1079 = vmatprep.subr.bf16.mxu1 %v1200_v1 }
  0x24   : > { %593 = vmatpush1.bf16.msra.mxu0 %v1125_v10  ;;  %1089 = vmatpush1.bf16.msra.mxu1 %v1125_v10 }
  0x25   : > { %594 = vmatprep.subr.bf16.mxu0 %v1200_v1  ;;  %1080 = vmatprep.subr.bf16.mxu1 %v1200_v1 }
  0x28   : > { %595 = vmatpush1.bf16.msra.mxu0 %v1126_v13  ;;  %1090 = vmatpush1.bf16.msra.mxu1 %v1126_v13 }
  0x29   : > { %596 = vmatprep.subr.bf16.mxu0 %v1200_v1  ;;  %1081 = vmatprep.subr.bf16.mxu1 %v1200_v1 }
  0x2c   : > { %597 = vmatpush1.bf16.msra.mxu0 %v576_v16  ;;  %1091 = vmatpush1.bf16.msra.mxu1 %v576_v16 }
  0x2f   : > { %611 = vmatmul.mubr.bf16.vlgmr.msra.gmra.mrb[0].mxu0 %v1128_v17  ;;  %675 = vmatmul.mubr.bf16.vlgmr.msra.gmra.mrb[0].mxu1 %v1131_v18 }
  0x30   : > { %1052 = vmatprep.mubr.msk.bf16.mxu0 %vm522_vm0, %v1134_v19  ;;  %1060 = vmatprep.mubr.msk.bf16.mxu1 %vm522_vm0, %v1136_v20 }
  0x37   : > { %619 = vmatmul.mubr.bf16.gmra.mrb[4].mxu0 %v1138_v21  ;;  %683 = vmatmul.mubr.bf16.gmra.mrb[4].mxu1 %v1139_v22 }
  0x38   : > { %1053 = vmatprep.mubr.msk.bf16.mxu0 %vm522_vm0, %v1140_v23  ;;  %1061 = vmatprep.mubr.msk.bf16.mxu1 %vm522_vm0, %v1142_v24 }
  0x3f   : > { %627 = vmatmul.mubr.bf16.gmra.mrb[8].mxu0 %v1144_v25  ;;  %691 = vmatmul.mubr.bf16.gmra.mrb[8].mxu1 %v1145_v26 }
  0x40   : > { %1054 = vmatprep.mubr.msk.bf16.mxu0 %vm522_vm0, %v1146_v27  ;;  %1062 = vmatprep.mubr.msk.bf16.mxu1 %vm522_vm0, %v1148_v28 }
  0x47   : > { %635 = vmatmul.mubr.bf16.gmra.mrb[12].mxu0 %v1150_v29  ;;  %699 = vmatmul.mubr.bf16.gmra.mrb[12].mxu1 %v1151_v30 }
  0x48   : > { %1055 = vmatprep.mubr.msk.bf16.mxu0 %vm522_vm0, %v1152_v31  ;;  %1063 = vmatprep.mubr.msk.bf16.mxu1 %vm522_vm0, %v1154_v32 }
  0x4f   : > { %643 = vmatmul.mubr.bf16.gmra.mrb[16].mxu0 %v1156_v33  ;;  %707 = vmatmul.mubr.bf16.gmra.mrb[16].mxu1 %v1157_v34 }
  0x50   : > { %1056 = vmatprep.mubr.msk.bf16.mxu0 %vm522_vm0, %v1158_v35  ;;  %1064 = vmatprep.mubr.msk.bf16.mxu1 %vm522_vm0, %v1160_v36 }
  0x57   : > { %651 = vmatmul.mubr.bf16.gmra.mrb[20].mxu0 %v1162_v37  ;;  %715 = vmatmul.mubr.bf16.gmra.mrb[20].mxu1 %v1163_v38 }
  0x58   : > { %1057 = vmatprep.mubr.msk.bf16.mxu0 %vm522_vm0, %v1164_v39  ;;  %1065 = vmatprep.mubr.msk.bf16.mxu1 %vm522_vm0, %v1166_v40 }
  0x5f   : > { %659 = vmatmul.mubr.bf16.gmra.mrb[24].mxu0 %v1168_v41  ;;  %723 = vmatmul.mubr.bf16.gmra.mrb[24].mxu1 %v1169_v42 }
  0x60   : > { %1058 = vmatprep.mubr.msk.bf16.mxu0 %vm522_vm0, %v1170_v43  ;;  %1066 = vmatprep.mubr.msk.bf16.mxu1 %vm522_vm0, %v1172_v44 }
  0x67   : > { %667 = vmatmul.mubr.bf16.gmra.mrb[28].mxu0 %v1174_v45  ;;  %731 = vmatmul.mubr.bf16.gmra.mrb[28].mxu1 %v1175_v46 }
 0x102   : > { %v612_v48 = vpop.f32.mrb[0].mxu0  ;;  %v676_v50 = vpop.f32.mrb[0].mxu1 }
 0x103   : > { %v746_v51 = vmul.f32 %v1336_v47, %v612_v48  ;;  %v762_v52 = vmul.f32 %v1336_v47, %v676_v50  ;;  %v614_v53 = vpop.f32.mrb[1].mxu0  ;;  %v678_v54 = vpop.f32.mrb[1].mxu1 }
 0x104   : > { %v615_v55 = vpop.f32.mrb[2].mxu0  ;;  %v679_v56 = vpop.f32.mrb[2].mxu1 }
 0x105   : > { %v785_v57 = vadd.f32 %v1341_v49, %v746_v51  ;;  %v801_v58 = vadd.f32 %v1341_v49, %v762_v52  ;;  %v747_v59 = vmul.f32 %v1336_v47, %v615_v55  ;;  %v763_v60 = vmul.f32 %v1336_v47, %v679_v56  ;;  %v617_v61 = vpop.f32.mrb[3].mxu0  ;;  %v681_v62 = vpop.f32.mrb[3].mxu1 }
 0x107   : > { %v817_v63 = vmax.f32 %v785_v57, 0.0  ;;  %v833_v0 = vmax.f32 %v801_v58, 0.0  ;;  %v786_v1 = vadd.f32 %v1341_v49, %v747_v59  ;;  %v802_v2 = vadd.f32 %v1341_v49, %v763_v60 }
 0x109   : > { %850 = vst.msk [vmem:[%s1354_s29] sm:$0xff] %vm849_vm3, %v817_v63  ;;  %866 = vst.msk [vmem:[%s1354_s29 + $0x80] sm:$0xff] %vm849_vm3, %v833_v0  ;;  %v818_v3 = vmax.f32 %v786_v1, 0.0  ;;  %v834_v4 = vmax.f32 %v802_v2, 0.0 }
 0x10a   : > { %v620_v5 = vpop.f32.mrb[4].mxu0  ;;  %v684_v6 = vpop.f32.mrb[4].mxu1 }
 0x10b   : > { %851 = vst.msk [vmem:[%s1354_s29 + $0x8] sm:$0xff] %vm849_vm3, %v818_v3  ;;  %867 = vst.msk [vmem:[%s1354_s29 + $0x88] sm:$0xff] %vm849_vm3, %v834_v4  ;;  %v748_v7 = vmul.f32 %v1336_v47, %v620_v5  ;;  %v764_v8 = vmul.f32 %v1336_v47, %v684_v6  ;;  %v622_v9 = vpop.f32.mrb[5].mxu0  ;;  %v686_v10 = vpop.f32.mrb[5].mxu1 }
 0x10c   : > { %v623_v11 = vpop.f32.mrb[6].mxu0  ;;  %v687_v12 = vpop.f32.mrb[6].mxu1 }
 0x10d   : > { %v787_v13 = vadd.f32 %v1341_v49, %v748_v7  ;;  %v803_v14 = vadd.f32 %v1341_v49, %v764_v8  ;;  %v749_v15 = vmul.f32 %v1336_v47, %v623_v11  ;;  %v765_v16 = vmul.f32 %v1336_v47, %v687_v12  ;;  %v625_v17 = vpop.f32.mrb[7].mxu0  ;;  %v689_v18 = vpop.f32.mrb[7].mxu1 }
 0x10f   : > { %v819_v19 = vmax.f32 %v787_v13, 0.0  ;;  %v835_v20 = vmax.f32 %v803_v14, 0.0  ;;  %v788_v21 = vadd.f32 %v1341_v49, %v749_v15  ;;  %v804_v22 = vadd.f32 %v1341_v49, %v765_v16 }
 0x111   : > { %852 = vst.msk [vmem:[%s1354_s29 + $0x10] sm:$0xff] %vm849_vm3, %v819_v19  ;;  %868 = vst.msk [vmem:[%s1354_s29 + $0x90] sm:$0xff] %vm849_vm3, %v835_v20  ;;  %v820_v23 = vmax.f32 %v788_v21, 0.0  ;;  %v836_v24 = vmax.f32 %v804_v22, 0.0 }
 0x112   : > { %v628_v25 = vpop.f32.mrb[8].mxu0  ;;  %v692_v26 = vpop.f32.mrb[8].mxu1 }
 0x113   : > { %853 = vst.msk [vmem:[%s1354_s29 + $0x18] sm:$0xff] %vm849_vm3, %v820_v23  ;;  %869 = vst.msk [vmem:[%s1354_s29 + $0x98] sm:$0xff] %vm849_vm3, %v836_v24  ;;  %v750_v27 = vmul.f32 %v1336_v47, %v628_v25  ;;  %v766_v28 = vmul.f32 %v1336_v47, %v692_v26  ;;  %v630_v29 = vpop.f32.mrb[9].mxu0  ;;  %v694_v30 = vpop.f32.mrb[9].mxu1 }
 0x114   : > { %v631_v31 = vpop.f32.mrb[10].mxu0  ;;  %v695_v32 = vpop.f32.mrb[10].mxu1 }
 0x115   : > { %v789_v33 = vadd.f32 %v1341_v49, %v750_v27  ;;  %v805_v34 = vadd.f32 %v1341_v49, %v766_v28  ;;  %v751_v35 = vmul.f32 %v1336_v47, %v631_v31  ;;  %v767_v36 = vmul.f32 %v1336_v47, %v695_v32  ;;  %v633_v37 = vpop.f32.mrb[11].mxu0  ;;  %v697_v38 = vpop.f32.mrb[11].mxu1 }
 0x117   : > { %v821_v39 = vmax.f32 %v789_v33, 0.0  ;;  %v837_v40 = vmax.f32 %v805_v34, 0.0  ;;  %v790_v41 = vadd.f32 %v1341_v49, %v751_v35  ;;  %v806_v42 = vadd.f32 %v1341_v49, %v767_v36 }
 0x119   : > { %854 = vst.msk [vmem:[%s1354_s29 + $0x20] sm:$0xff] %vm849_vm3, %v821_v39  ;;  %870 = vst.msk [vmem:[%s1354_s29 + $0xa0] sm:$0xff] %vm849_vm3, %v837_v40  ;;  %v822_v43 = vmax.f32 %v790_v41, 0.0  ;;  %v838_v44 = vmax.f32 %v806_v42, 0.0 }
 0x11a   : > { %v636_v45 = vpop.f32.mrb[12].mxu0  ;;  %v700_v46 = vpop.f32.mrb[12].mxu1 }
 0x11b   : > { %855 = vst.msk [vmem:[%s1354_s29 + $0x28] sm:$0xff] %vm849_vm3, %v822_v43  ;;  %871 = vst.msk [vmem:[%s1354_s29 + $0xa8] sm:$0xff] %vm849_vm3, %v838_v44  ;;  %v752_v48 = vmul.f32 %v1336_v47, %v636_v45  ;;  %v768_v50 = vmul.f32 %v1336_v47, %v700_v46  ;;  %v638_v51 = vpop.f32.mrb[13].mxu0  ;;  %v702_v52 = vpop.f32.mrb[13].mxu1 }
 0x11c   : > { %v639_v53 = vpop.f32.mrb[14].mxu0  ;;  %v703_v54 = vpop.f32.mrb[14].mxu1 }
 0x11d   : > { %v791_v55 = vadd.f32 %v1341_v49, %v752_v48  ;;  %v807_v56 = vadd.f32 %v1341_v49, %v768_v50  ;;  %v753_v57 = vmul.f32 %v1336_v47, %v639_v53  ;;  %v769_v58 = vmul.f32 %v1336_v47, %v703_v54  ;;  %v641_v59 = vpop.f32.mrb[15].mxu0  ;;  %v705_v60 = vpop.f32.mrb[15].mxu1 }
 0x11f   : > { %v823_v61 = vmax.f32 %v791_v55, 0.0  ;;  %v839_v62 = vmax.f32 %v807_v56, 0.0  ;;  %v792_v63 = vadd.f32 %v1341_v49, %v753_v57  ;;  %v808_v0 = vadd.f32 %v1341_v49, %v769_v58 }
 0x121   : > { %856 = vst.msk [vmem:[%s1354_s29 + $0x30] sm:$0xff] %vm849_vm3, %v823_v61  ;;  %872 = vst.msk [vmem:[%s1354_s29 + $0xb0] sm:$0xff] %vm849_vm3, %v839_v62  ;;  %v824_v1 = vmax.f32 %v792_v63, 0.0  ;;  %v840_v2 = vmax.f32 %v808_v0, 0.0 }
 0x122   : > { %v644_v3 = vpop.f32.mrb[16].mxu0  ;;  %v708_v4 = vpop.f32.mrb[16].mxu1 }
 0x123   : > { %857 = vst.msk [vmem:[%s1354_s29 + $0x38] sm:$0xff] %vm849_vm3, %v824_v1  ;;  %873 = vst.msk [vmem:[%s1354_s29 + $0xb8] sm:$0xff] %vm849_vm3, %v840_v2  ;;  %v754_v5 = vmul.f32 %v1336_v47, %v644_v3  ;;  %v770_v6 = vmul.f32 %v1336_v47, %v708_v4  ;;  %v646_v7 = vpop.f32.mrb[17].mxu0  ;;  %v710_v8 = vpop.f32.mrb[17].mxu1 }
 0x124   : > { %v647_v9 = vpop.f32.mrb[18].mxu0  ;;  %v711_v10 = vpop.f32.mrb[18].mxu1 }
 0x125   : > { %v793_v11 = vadd.f32 %v1341_v49, %v754_v5  ;;  %v809_v12 = vadd.f32 %v1341_v49, %v770_v6  ;;  %v755_v13 = vmul.f32 %v1336_v47, %v647_v9  ;;  %v771_v14 = vmul.f32 %v1336_v47, %v711_v10  ;;  %v649_v15 = vpop.f32.mrb[19].mxu0  ;;  %v713_v16 = vpop.f32.mrb[19].mxu1 }
 0x127   : > { %v825_v17 = vmax.f32 %v793_v11, 0.0  ;;  %v841_v18 = vmax.f32 %v809_v12, 0.0  ;;  %v794_v19 = vadd.f32 %v1341_v49, %v755_v13  ;;  %v810_v20 = vadd.f32 %v1341_v49, %v771_v14 }
 0x129   : > { %858 = vst.msk [vmem:[%s1354_s29 + $0x40] sm:$0xff] %vm849_vm3, %v825_v17  ;;  %874 = vst.msk [vmem:[%s1354_s29 + $0xc0] sm:$0xff] %vm849_vm3, %v841_v18  ;;  %v826_v21 = vmax.f32 %v794_v19, 0.0  ;;  %v842_v22 = vmax.f32 %v810_v20, 0.0 }
 0x12a   : > { %v652_v23 = vpop.f32.mrb[20].mxu0  ;;  %v716_v24 = vpop.f32.mrb[20].mxu1 }
 0x12b   : > { %859 = vst.msk [vmem:[%s1354_s29 + $0x48] sm:$0xff] %vm849_vm3, %v826_v21  ;;  %875 = vst.msk [vmem:[%s1354_s29 + $0xc8] sm:$0xff] %vm849_vm3, %v842_v22  ;;  %v756_v25 = vmul.f32 %v1336_v47, %v652_v23  ;;  %v772_v26 = vmul.f32 %v1336_v47, %v716_v24  ;;  %v654_v27 = vpop.f32.mrb[21].mxu0  ;;  %v718_v28 = vpop.f32.mrb[21].mxu1 }
 0x12c   : > { %v655_v29 = vpop.f32.mrb[22].mxu0  ;;  %v719_v30 = vpop.f32.mrb[22].mxu1 }
 0x12d   : > { %v795_v31 = vadd.f32 %v1341_v49, %v756_v25  ;;  %v811_v32 = vadd.f32 %v1341_v49, %v772_v26  ;;  %v757_v33 = vmul.f32 %v1336_v47, %v655_v29  ;;  %v773_v34 = vmul.f32 %v1336_v47, %v719_v30  ;;  %v657_v35 = vpop.f32.mrb[23].mxu0  ;;  %v721_v36 = vpop.f32.mrb[23].mxu1 }
 0x12f   : > { %v827_v37 = vmax.f32 %v795_v31, 0.0  ;;  %v843_v38 = vmax.f32 %v811_v32, 0.0  ;;  %v796_v39 = vadd.f32 %v1341_v49, %v757_v33  ;;  %v812_v40 = vadd.f32 %v1341_v49, %v773_v34 }
 0x131   : > { %860 = vst.msk [vmem:[%s1354_s29 + $0x50] sm:$0xff] %vm849_vm3, %v827_v37  ;;  %876 = vst.msk [vmem:[%s1354_s29 + $0xd0] sm:$0xff] %vm849_vm3, %v843_v38  ;;  %v828_v41 = vmax.f32 %v796_v39, 0.0  ;;  %v844_v42 = vmax.f32 %v812_v40, 0.0 }
 0x132   : > { %v660_v43 = vpop.f32.mrb[24].mxu0  ;;  %v724_v44 = vpop.f32.mrb[24].mxu1 }
 0x133   : > { %861 = vst.msk [vmem:[%s1354_s29 + $0x58] sm:$0xff] %vm849_vm3, %v828_v41  ;;  %877 = vst.msk [vmem:[%s1354_s29 + $0xd8] sm:$0xff] %vm849_vm3, %v844_v42  ;;  %v758_v45 = vmul.f32 %v1336_v47, %v660_v43  ;;  %v774_v46 = vmul.f32 %v1336_v47, %v724_v44  ;;  %v662_v48 = vpop.f32.mrb[25].mxu0  ;;  %v726_v50 = vpop.f32.mrb[25].mxu1 }
 0x134   : > { %v663_v51 = vpop.f32.mrb[26].mxu0  ;;  %v727_v52 = vpop.f32.mrb[26].mxu1 }
 0x135   : > { %v797_v53 = vadd.f32 %v1341_v49, %v758_v45  ;;  %v813_v54 = vadd.f32 %v1341_v49, %v774_v46  ;;  %v759_v55 = vmul.f32 %v1336_v47, %v663_v51  ;;  %v775_v56 = vmul.f32 %v1336_v47, %v727_v52  ;;  %v665_v57 = vpop.f32.mrb[27].mxu0  ;;  %v729_v58 = vpop.f32.mrb[27].mxu1 }
 0x137   : > { %v829_v59 = vmax.f32 %v797_v53, 0.0  ;;  %v845_v60 = vmax.f32 %v813_v54, 0.0  ;;  %v798_v61 = vadd.f32 %v1341_v49, %v759_v55  ;;  %v814_v62 = vadd.f32 %v1341_v49, %v775_v56 }
 0x139   : > { %862 = vst.msk [vmem:[%s1354_s29 + $0x60] sm:$0xff] %vm849_vm3, %v829_v59  ;;  %878 = vst.msk [vmem:[%s1354_s29 + $0xe0] sm:$0xff] %vm849_vm3, %v845_v60  ;;  %v830_v63 = vmax.f32 %v798_v61, 0.0  ;;  %v846_v0 = vmax.f32 %v814_v62, 0.0 }
 0x13a   : > { %v668_v1 = vpop.f32.mrb[28].mxu0  ;;  %v732_v2 = vpop.f32.mrb[28].mxu1 }
 0x13b   : > { %863 = vst.msk [vmem:[%s1354_s29 + $0x68] sm:$0xff] %vm849_vm3, %v830_v63  ;;  %879 = vst.msk [vmem:[%s1354_s29 + $0xe8] sm:$0xff] %vm849_vm3, %v846_v0  ;;  %v760_v3 = vmul.f32 %v1336_v47, %v668_v1  ;;  %v776_v4 = vmul.f32 %v1336_v47, %v732_v2  ;;  %v670_v5 = vpop.f32.mrb[29].mxu0  ;;  %v734_v6 = vpop.f32.mrb[29].mxu1 }
 0x13c   : > { %v671_v7 = vpop.f32.mrb[30].mxu0  ;;  %v735_v8 = vpop.f32.mrb[30].mxu1 }
 0x13d   : > { %v799_v9 = vadd.f32 %v1341_v49, %v760_v3  ;;  %v815_v10 = vadd.f32 %v1341_v49, %v776_v4  ;;  %v761_v11 = vmul.f32 %v1336_v47, %v671_v7  ;;  %v777_v12 = vmul.f32 %v1336_v47, %v735_v8  ;;  %v673_v13 = vpop.f32.mrb[31].mxu0  ;;  %v737_v14 = vpop.f32.mrb[31].mxu1 }
 0x13f   : > { %v831_v15 = vmax.f32 %v799_v9, 0.0  ;;  %v847_v16 = vmax.f32 %v815_v10, 0.0  ;;  %v800_v17 = vadd.f32 %v1341_v49, %v761_v11  ;;  %v816_v18 = vadd.f32 %v1341_v49, %v777_v12 }
 0x141   : > { %864 = vst.msk [vmem:[%s1354_s29 + $0x70] sm:$0xff] %vm849_vm3, %v831_v15  ;;  %880 = vst.msk [vmem:[%s1354_s29 + $0xf0] sm:$0xff] %vm849_vm3, %v847_v16  ;;  %v832_v19 = vmax.f32 %v800_v17, 0.0  ;;  %v848_v20 = vmax.f32 %v816_v18, 0.0 }
 0x143   : > { %865 = vst.msk [vmem:[%s1354_s29 + $0x78] sm:$0xff] %vm849_vm3, %v832_v19  ;;  %881 = vst.msk [vmem:[%s1354_s29 + $0xf8] sm:$0xff] %vm849_vm3, %v848_v20 }
 0x144 PF: > { %s14_s17 = sadd.s32 1, %s1198_s17   ;;  %s1492_s15 = smov %s1194_s16 }
 0x145   : > { %p11_p5 = scmp.ge.s32.totalorder %s14_s17, 4   ;;  %s1493_s16 = smov %s1495_s18 }
 0x147   :  { %13 = sbr.rel (!%p11_p5) target bundleno = 2 (0x2), region = 75 }

</bundles_post_ra>
